<compile_context>
chip_gen: v7x
topology: tpu7x:2x2x1
jax: 0.10.0
libtpu: 0.0.40
codegen_flags: <defaults>
</compile_context>

<pallas_src>
import functools

import jax
import jax.numpy as jnp
from jax.experimental import pallas as pl
from jax.experimental.pallas import tpu as pltpu

# ----------------------------- hyperparameters ------------------------------
VOCAB = 64          # vocab size; EOT token id = VOCAB - 1 (argmax convention)
SEQ = 8             # context length
D_MODEL = 32        # transformer width
N_HEADS = 2
HEAD_DIM = D_MODEL // N_HEADS
N_LAYERS = 2
EMBED_DIM = 16      # output text-embedding dim (text_projection)
LN_EPS = 1e-5

D_PAD = 128                 # lane-padded model width
H_PAD = 4 * D_MODEL         # MLP hidden width (= 128, already lane-dense)
VEC_ROWS = 16               # sublane-padded row count of the per-layer vector slab
W_COLS = 6 * D_PAD          # [ Wq | Wk | Wv | Wout | Wfc | Wproj ] lane blocks


# ------------------------------ fused kernel --------------------------------
def _text_encoder_kernel(x_ref, w_ref, vec_ref, lnf_ref, o_ref, x_scr, *, batch):
    layer = pl.program_id(0)
    M = batch * SEQ

    @pl.when(layer == 0)
    def _init():
        x_scr[...] = x_ref[...].astype(jnp.float32)

    def layer_norm(v, g, b):
        # Stats over the real D_MODEL lanes only: padded lanes of v are zero,
        # and padded lanes of g/b are zero so padded output lanes stay zero.
        mean = jnp.sum(v, axis=-1, keepdims=True) * (1.0 / D_MODEL)
        ex2 = jnp.sum(v * v, axis=-1, keepdims=True) * (1.0 / D_MODEL)
        var = ex2 - mean * mean
        inv = jax.lax.rsqrt(var + LN_EPS)
        return (v - mean) * inv * g + b

    def mxu(a_f32, w_bf16):
        # bf16 MXU inputs, f32 accumulation.
        return jnp.dot(a_f32.astype(jnp.bfloat16), w_bf16,
                       preferred_element_type=jnp.float32)

    w = w_ref[...]                       # [128, 768] bf16, this layer's weights
    vec = vec_ref[...]                   # [16, 128]  f32, LN params + biases

    def row(i):
        return vec[i:i + 1, :]           # [1, 128], broadcasts over rows

    ln1_g, ln1_b = row(0), row(1)
    b_q, b_k, b_v = row(2), row(3), row(4)      # b_q already holds scale fold
    b_out = row(5)
    ln2_g, ln2_b = row(6), row(7)
    b_fc, b_proj = row(8), row(9)

    # lane-aligned (multiple-of-128) weight slices
    w_qkv = w[:, 0:3 * D_PAD]
    w_out = w[:, 3 * D_PAD:4 * D_PAD]
    w_fc = w[:, 4 * D_PAD:5 * D_PAD]
    w_pr = w[:, 5 * D_PAD:6 * D_PAD]

    x = x_scr[...]                                           # [M, 128] f32

    # ---------------- self-attention sub-block ----------------
    h = layer_norm(x, ln1_g, ln1_b)
    qkv = mxu(h, w_qkv)                                      # [M, 384]
    q = qkv[:, 0:D_PAD] + b_q                                # 1/sqrt(Dh) folded in
    k = qkv[:, D_PAD:2 * D_PAD] + b_k
    v = qkv[:, 2 * D_PAD:3 * D_PAD] + b_v

    # causal mask generated in-kernel (no DMA'd mask array)
    row_id = jax.lax.broadcasted_iota(jnp.int32, (SEQ, SEQ), 0)
    col_id = jax.lax.broadcasted_iota(jnp.int32, (SEQ, SEQ), 1)
    causal = (col_id <= row_id)[None, :, :]                  # [1, S, S]

    head_outs = []
    for hd in range(N_HEADS):                                # unrolled, tiny
        lo = hd * HEAD_DIM
        q_h = q[:, lo:lo + HEAD_DIM].reshape(batch, SEQ, HEAD_DIM)
        k_h = k[:, lo:lo + HEAD_DIM].reshape(batch, SEQ, HEAD_DIM)
        v_h = v[:, lo:lo + HEAD_DIM].reshape(batch, SEQ, HEAD_DIM)
        s = jnp.einsum("bqd,bkd->bqk", q_h, k_h,
                       preferred_element_type=jnp.float32)   # [B, S, S]
        s = jnp.where(causal, s, -1e30)
        m = jnp.max(s, axis=-1, keepdims=True)
        p = jnp.exp(s - m)
        denom = jnp.sum(p, axis=-1, keepdims=True)
        o_h = jnp.einsum("bqk,bkd->bqd", p, v_h,
                         preferred_element_type=jnp.float32)
        o_h = o_h * pl.reciprocal(denom, approx=True)        # EUP, off VPU path
        head_outs.append(o_h.reshape(M, HEAD_DIM))
    attn = jnp.concatenate(
        head_outs + [jnp.zeros((M, D_PAD - D_MODEL), jnp.float32)],
        axis=-1)                                             # [M, 128]
    x = x + mxu(attn, w_out) + b_out

    # ---------------- MLP sub-block (QuickGELU) ----------------
    h2 = layer_norm(x, ln2_g, ln2_b)
    fc = mxu(h2, w_fc) + b_fc                                # [M, 128]
    fc = fc * jax.nn.sigmoid(1.702 * fc)                     # QuickGELU (f32)
    x = x + mxu(fc, w_pr) + b_proj

    x_scr[...] = x

    @pl.when(layer == pl.num_programs(0) - 1)
    def _final():
        y = layer_norm(x, lnf_ref[0:1, :], lnf_ref[1:2, :])
        o_ref[...] = y.astype(o_ref.dtype)


def clip_text_transformer(x_pad, w_all, vec_all, lnf, *, batch):
    """x_pad: [B*S, 128] f32 -> [B*S, 128] f32 (post final LayerNorm)."""
    M, Dp = x_pad.shape
    kernel = functools.partial(_text_encoder_kernel, batch=batch)
    lay = lambda l: (l, 0, 0)      # per-layer stacked params
    rep = lambda l: (0, 0)         # layer-invariant blocks
    return pl.pallas_call(
        kernel,
        out_shape=jax.ShapeDtypeStruct((M, Dp), jnp.float32),
        grid=(N_LAYERS,),
        in_specs=[
            pl.BlockSpec((M, Dp), rep),                   # x (resident)
            pl.BlockSpec((None, Dp, W_COLS), lay),        # weight slab (bf16)
            pl.BlockSpec((None, VEC_ROWS, Dp), lay),      # LN params + biases (f32)
            pl.BlockSpec((8, Dp), rep),                   # ln_final g/b rows
        ],
        out_specs=pl.BlockSpec((M, Dp), rep),
        scratch_shapes=[pltpu.VMEM((M, Dp), jnp.float32)],
        compiler_params=pltpu.CompilerParams(
            dimension_semantics=("arbitrary",)),          # sequential layer dep
    )(x_pad, w_all, vec_all, lnf)


# --------------------------- model / parameters -----------------------------
def init_params(key):
    keys = jax.random.split(key, 4 + 8 * N_LAYERS)
    ki = iter(keys)
    p = {
        "token_embedding": 0.02 * jax.random.normal(next(ki), (VOCAB, D_MODEL), jnp.float32),
        "positional_embedding": 0.01 * jax.random.normal(next(ki), (SEQ, D_MODEL), jnp.float32),
        "text_projection": 0.02 * jax.random.normal(next(ki), (D_MODEL, EMBED_DIM), jnp.float32),
        "ln_final_g": jnp.ones((D_MODEL,), jnp.float32),
        "ln_final_b": jnp.zeros((D_MODEL,), jnp.float32),
        "layers": [],
    }
    for _ in range(N_LAYERS):
        layer = {
            "ln1_g": jnp.ones((D_MODEL,), jnp.float32),
            "ln1_b": jnp.zeros((D_MODEL,), jnp.float32),
            "w_qkv": 0.02 * jax.random.normal(next(ki), (D_MODEL, 3 * D_MODEL), jnp.float32),
            "b_qkv": jnp.zeros((3 * D_MODEL,), jnp.float32),
            "w_out": 0.02 * jax.random.normal(next(ki), (D_MODEL, D_MODEL), jnp.float32),
            "b_out": jnp.zeros((D_MODEL,), jnp.float32),
            "ln2_g": jnp.ones((D_MODEL,), jnp.float32),
            "ln2_b": jnp.zeros((D_MODEL,), jnp.float32),
            "w_fc": 0.02 * jax.random.normal(next(ki), (D_MODEL, 4 * D_MODEL), jnp.float32),
            "b_fc": jnp.zeros((4 * D_MODEL,), jnp.float32),
            "w_proj": 0.02 * jax.random.normal(next(ki), (4 * D_MODEL, D_MODEL), jnp.float32),
            "b_proj": jnp.zeros((D_MODEL,), jnp.float32),
        }
        p["layers"].append(layer)
    return p


def _pad_to(a, shape):
    return jnp.pad(a, [(0, t - s) for s, t in zip(a.shape, shape)])


def pack_params(p):
    """Pad to lane-dense 128-wide layout, fold the attention scale into W_q/b_q,
    and consolidate per-layer params into one bf16 weight slab + one f32 vector
    slab (stacked over layers)."""
    scale = 1.0 / (HEAD_DIM ** 0.5)
    w_all, vec_all = [], []
    for lyr in p["layers"]:
        wq, wk, wv = jnp.split(lyr["w_qkv"], 3, axis=1)          # [D, D] each
        w_layer = jnp.concatenate([
            _pad_to(wq * scale, (D_PAD, D_PAD)),                  # scale folded
            _pad_to(wk, (D_PAD, D_PAD)),
            _pad_to(wv, (D_PAD, D_PAD)),
            _pad_to(lyr["w_out"], (D_PAD, D_PAD)),
            _pad_to(lyr["w_fc"], (D_PAD, H_PAD)),
            _pad_to(lyr["w_proj"], (H_PAD, D_PAD)),
        ], axis=1)                                                # [128, 768]
        w_all.append(w_layer)

        bq, bk, bv = jnp.split(lyr["b_qkv"], 3)
        rows = [
            lyr["ln1_g"], lyr["ln1_b"],
            bq * scale, bk, bv,
            lyr["b_out"],
            lyr["ln2_g"], lyr["ln2_b"],
            lyr["b_fc"], lyr["b_proj"],
        ]
        vec = jnp.zeros((VEC_ROWS, D_PAD), jnp.float32)
        for i, r in enumerate(rows):
            vec = vec.at[i, :r.shape[0]].set(r.astype(jnp.float32))
        vec_all.append(vec)

    lnf = jnp.zeros((8, D_PAD), jnp.float32)
    lnf = lnf.at[0, :D_MODEL].set(p["ln_final_g"])
    lnf = lnf.at[1, :D_MODEL].set(p["ln_final_b"])

    return (jnp.stack(w_all, axis=0).astype(jnp.bfloat16),   # MXU inputs in bf16
            jnp.stack(vec_all, axis=0),                      # LN/bias rows in f32
            lnf)


def encode_text(params, packed, text):
    """text: int32 [B, S] token ids -> [B, EMBED_DIM] text features."""
    B, S = text.shape
    w_all, vec_all, lnf = packed
    # token + positional embedding (glue; trivial gather stays in XLA)
    tok_pad = _pad_to(params["token_embedding"], (VOCAB, D_PAD))
    pos_pad = _pad_to(params["positional_embedding"], (SEQ, D_PAD))
    x = jnp.take(tok_pad, text, axis=0) + pos_pad[None, :, :]      # [B, S, 128]
    x = x.reshape(B * S, D_PAD).astype(jnp.float32)

    y = clip_text_transformer(x, w_all, vec_all, lnf, batch=B)     # [B*S, 128]
    y = y.reshape(B, S, D_PAD)

    # EOT-token gather + text projection: tiny, kept in plain XLA.
    eot_idx = jnp.argmax(text, axis=-1)                            # [B]
    x_eot = y[jnp.arange(B), eot_idx, :D_MODEL]                    # [B, D]
    return x_eot @ params["text_projection"]                       # [B, EMBED]


# --------------------------- pure-JAX reference ------------------------------
def encode_text_ref(params, text):
    B, S = text.shape
    scale = 1.0 / (HEAD_DIM ** 0.5)
    causal = jnp.tril(jnp.ones((S, S), bool))

    def ln(v, g, b):
        m = v.mean(-1, keepdims=True)
        var = ((v - m) ** 2).mean(-1, keepdims=True)
        return (v - m) * jax.lax.rsqrt(var + LN_EPS) * g + b

    def mm(a, w):  # same dtype policy as the kernel: bf16 inputs, f32 accum
        return jnp.dot(a.astype(jnp.bfloat16), w.astype(jnp.bfloat16),
                       preferred_element_type=jnp.float32)

    x = params["token_embedding"][text] + params["positional_embedding"][None]
    x = x.astype(jnp.float32)                                      # [B, S, D]
    for lyr in params["layers"]:
        h = ln(x, lyr["ln1_g"], lyr["ln1_b"])
        qkv = mm(h.reshape(B * S, D_MODEL), lyr["w_qkv"]) + lyr["b_qkv"]
        qkv = qkv.reshape(B, S, 3, N_HEADS, HEAD_DIM)
        q = qkv[:, :, 0].transpose(0, 2, 1, 3) * scale             # [B,H,S,Dh]
        k = qkv[:, :, 1].transpose(0, 2, 1, 3)
        v = qkv[:, :, 2].transpose(0, 2, 1, 3)
        s = jnp.einsum("bhqd,bhkd->bhqk", q, k)
        s = jnp.where(causal[None, None], s, -1e30)
        p = jax.nn.softmax(s, axis=-1)
        o = jnp.einsum("bhqk,bhkd->bhqd", p, v)
        o = o.transpose(0, 2, 1, 3).reshape(B * S, D_MODEL)
        x = x + (mm(o, lyr["w_out"]) + lyr["b_out"]).reshape(B, S, D_MODEL)
        h2 = ln(x, lyr["ln2_g"], lyr["ln2_b"])
        fc = mm(h2.reshape(B * S, D_MODEL), lyr["w_fc"]) + lyr["b_fc"]
        fc = fc * jax.nn.sigmoid(1.702 * fc)
        x = x + (mm(fc, lyr["w_proj"]) + lyr["b_proj"]).reshape(B, S, D_MODEL)
    y = ln(x, params["ln_final_g"], params["ln_final_b"])
    eot_idx = jnp.argmax(text, axis=-1)
    x_eot = y[jnp.arange(B), eot_idx]
    return x_eot @ params["text_projection"]


# ----------------------------------- main ------------------------------------
if __name__ == "__main__":
    key = jax.random.PRNGKey(0)
    pkey, tkey = jax.random.split(key)
    params = init_params(pkey)
    packed = pack_params(params)

    B = 2
    # deterministic token ids; EOT token (= VOCAB-1) placed at the last slot
    tokens = jax.random.randint(tkey, (B, SEQ), 1, VOCAB - 1, dtype=jnp.int32)
    tokens = tokens.at[:, -1].set(VOCAB - 1)

    feats = jax.jit(encode_text)(params, packed, tokens)
    jax.block_until_ready(feats)

    assert feats.shape == (B, EMBED_DIM)
    assert bool(jnp.all(jnp.isfinite(feats)))

    ref = encode_text_ref(params, tokens)
    max_err = float(jnp.max(jnp.abs(feats - ref)))
    assert max_err < 1.5e-2, f"kernel/reference mismatch: max abs err = {max_err}"

    print("KERNEL_OK")
</pallas_src>

<mosaic_0001>
module attributes {stable_mosaic.version = 11 : i64} {
  func.func @_text_encoder_kernel(%arg0: i32, %arg1: memref<16x128xf32, #tpu.memory_space<vmem>>, %arg2: memref<1x128x768xbf16, #tpu.memory_space<vmem>>, %arg3: memref<1x16x128xf32, #tpu.memory_space<vmem>>, %arg4: memref<8x128xf32, #tpu.memory_space<vmem>>, %arg5: memref<16x128xf32, #tpu.memory_space<vmem>>, %arg6: memref<16x128xf32, #tpu.memory_space<vmem>>) attributes {dimension_semantics = [#tpu.dimension_semantics<arbitrary>], iteration_bounds = array<i64: 2>, scalar_prefetch = 0 : i64, scratch_operands = 1 : i64, tpu.core_type = #tpu.core_type<tc>, window_params = [{pipeline_mode = #tpu.pipeline_mode<synchronous>, transform_indices = @transform_0, window_bounds = array<i64: 16, 128>}, {transform_indices = @transform_1, window_bounds = array<i64: 1, 128, 768>}, {transform_indices = @transform_2, window_bounds = array<i64: 1, 16, 128>}, {pipeline_mode = #tpu.pipeline_mode<synchronous>, transform_indices = @transform_3, window_bounds = array<i64: 8, 128>}, {pipeline_mode = #tpu.pipeline_mode<synchronous>, transform_indices = @transform_4, window_bounds = array<i64: 16, 128>}]} {
    %c0_i32 = arith.constant 0 : i32
    %0 = arith.cmpi eq, %arg0, %c0_i32 : i32
    %1 = arith.extui %0 : i1 to i32
    %c0_i32_0 = arith.constant 0 : i32
    %2 = arith.cmpi ne, %1, %c0_i32_0 : i32
    scf.if %2 {
      %c0_37 = arith.constant 0 : index
      %c0_38 = arith.constant 0 : index
      %155 = vector.load %arg1[%c0_37, %c0_38] : memref<16x128xf32, #tpu.memory_space<vmem>>, vector<16x128xf32>
      %c0_39 = arith.constant 0 : index
      %c0_40 = arith.constant 0 : index
      %156 = vector.load %arg6[%c0_39, %c0_40] : memref<16x128xf32, #tpu.memory_space<vmem>>, vector<16x128xf32>
      tpu.vector_store %arg6[%c0_39, %c0_40], %155 {strides = array<i32>} : memref<16x128xf32, #tpu.memory_space<vmem>>, vector<16x128xf32>,
    } else {
    }
    %c0 = arith.constant 0 : index
    %c0_1 = arith.constant 0 : index
    %c0_2 = arith.constant 0 : index
    %3 = vector.load %arg2[%c0, %c0_1, %c0_2] : memref<1x128x768xbf16, #tpu.memory_space<vmem>>, vector<1x128x768xbf16>
    %4 = vector.shape_cast %3 : vector<1x128x768xbf16> to vector<128x768xbf16>
    %c0_3 = arith.constant 0 : index
    %c0_4 = arith.constant 0 : index
    %c0_5 = arith.constant 0 : index
    %5 = vector.load %arg3[%c0_3, %c0_4, %c0_5] : memref<1x16x128xf32, #tpu.memory_space<vmem>>, vector<1x16x128xf32>
    %6 = vector.shape_cast %5 : vector<1x16x128xf32> to vector<16x128xf32>
    %7 = vector.extract_strided_slice %6 {offsets = [0, 0], sizes = [1, 128], strides = [1, 1]} : vector<16x128xf32> to vector<1x128xf32>
    %8 = vector.extract_strided_slice %6 {offsets = [1, 0], sizes = [1, 128], strides = [1, 1]} : vector<16x128xf32> to vector<1x128xf32>
    %9 = vector.extract_strided_slice %6 {offsets = [2, 0], sizes = [1, 128], strides = [1, 1]} : vector<16x128xf32> to vector<1x128xf32>
    %10 = vector.extract_strided_slice %6 {offsets = [3, 0], sizes = [1, 128], strides = [1, 1]} : vector<16x128xf32> to vector<1x128xf32>
    %11 = vector.extract_strided_slice %6 {offsets = [4, 0], sizes = [1, 128], strides = [1, 1]} : vector<16x128xf32> to vector<1x128xf32>
    %12 = vector.extract_strided_slice %6 {offsets = [5, 0], sizes = [1, 128], strides = [1, 1]} : vector<16x128xf32> to vector<1x128xf32>
    %13 = vector.extract_strided_slice %6 {offsets = [6, 0], sizes = [1, 128], strides = [1, 1]} : vector<16x128xf32> to vector<1x128xf32>
    %14 = vector.extract_strided_slice %6 {offsets = [7, 0], sizes = [1, 128], strides = [1, 1]} : vector<16x128xf32> to vector<1x128xf32>
    %15 = vector.extract_strided_slice %6 {offsets = [8, 0], sizes = [1, 128], strides = [1, 1]} : vector<16x128xf32> to vector<1x128xf32>
    %16 = vector.extract_strided_slice %6 {offsets = [9, 0], sizes = [1, 128], strides = [1, 1]} : vector<16x128xf32> to vector<1x128xf32>
    %17 = vector.extract_strided_slice %4 {offsets = [0, 0], sizes = [128, 384], strides = [1, 1]} : vector<128x768xbf16> to vector<128x384xbf16>
    %18 = vector.extract_strided_slice %4 {offsets = [0, 384], sizes = [128, 128], strides = [1, 1]} : vector<128x768xbf16> to vector<128x128xbf16>
    %19 = vector.extract_strided_slice %4 {offsets = [0, 512], sizes = [128, 128], strides = [1, 1]} : vector<128x768xbf16> to vector<128x128xbf16>
    %20 = vector.extract_strided_slice %4 {offsets = [0, 640], sizes = [128, 128], strides = [1, 1]} : vector<128x768xbf16> to vector<128x128xbf16>
    %c0_6 = arith.constant 0 : index
    %c0_7 = arith.constant 0 : index
    %21 = vector.load %arg6[%c0_6, %c0_7] : memref<16x128xf32, #tpu.memory_space<vmem>>, vector<16x128xf32>
    %cst = arith.constant dense<0.000000e+00> : vector<16xf32>
    %22 = vector.multi_reduction <add>, %21, %cst [1] : vector<16x128xf32> to vector<16xf32>
    %23 = vector.shape_cast %22 : vector<16xf32> to vector<16x1xf32>
    %cst_8 = arith.constant 3.125000e-02 : f32
    %24 = vector.broadcast %cst_8 : f32 to vector<16x1xf32>
    %25 = arith.mulf %23, %24 : vector<16x1xf32>
    %26 = arith.mulf %21, %21 : vector<16x128xf32>
    %cst_9 = arith.constant dense<0.000000e+00> : vector<16xf32>
    %27 = vector.multi_reduction <add>, %26, %cst_9 [1] : vector<16x128xf32> to vector<16xf32>
    %28 = vector.shape_cast %27 : vector<16xf32> to vector<16x1xf32>
    %cst_10 = arith.constant 3.125000e-02 : f32
    %29 = vector.broadcast %cst_10 : f32 to vector<16x1xf32>
    %30 = arith.mulf %28, %29 : vector<16x1xf32>
    %31 = arith.mulf %25, %25 : vector<16x1xf32>
    %32 = arith.subf %30, %31 : vector<16x1xf32>
    %cst_11 = arith.constant 9.99999974E-6 : f32
    %33 = vector.broadcast %cst_11 : f32 to vector<16x1xf32>
    %34 = arith.addf %32, %33 : vector<16x1xf32>
    %35 = math.rsqrt %34 : vector<16x1xf32>
    %36 = vector.broadcast %25 : vector<16x1xf32> to vector<16x128xf32>
    %37 = arith.subf %21, %36 : vector<16x128xf32>
    %38 = vector.broadcast %35 : vector<16x1xf32> to vector<16x128xf32>
    %39 = arith.mulf %37, %38 : vector<16x128xf32>
    %40 = vector.broadcast %7 : vector<1x128xf32> to vector<16x128xf32>
    %41 = arith.mulf %39, %40 : vector<16x128xf32>
    %42 = vector.broadcast %8 : vector<1x128xf32> to vector<16x128xf32>
    %43 = arith.addf %41, %42 : vector<16x128xf32>
    %44 = arith.truncf %43 : vector<16x128xf32> to vector<16x128xbf16>
    %cst_12 = arith.constant dense<0.000000e+00> : vector<16x384xf32>
    %45 = tpu.matmul %44, %17, %cst_12 {dimension_numbers = #tpu.dot_dimension_numbers<[1], [0], [0], [1], [0, 0, 1, 1], [], []>} : vector<16x128xbf16>, vector<128x384xbf16>, vector<16x384xf32> -> vector<16x384xf32>
    %46 = vector.extract_strided_slice %45 {offsets = [0, 0], sizes = [16, 128], strides = [1, 1]} : vector<16x384xf32> to vector<16x128xf32>
    %47 = vector.broadcast %9 : vector<1x128xf32> to vector<16x128xf32>
    %48 = arith.addf %46, %47 : vector<16x128xf32>
    %49 = vector.extract_strided_slice %45 {offsets = [0, 128], sizes = [16, 128], strides = [1, 1]} : vector<16x384xf32> to vector<16x128xf32>
    %50 = vector.broadcast %10 : vector<1x128xf32> to vector<16x128xf32>
    %51 = arith.addf %49, %50 : vector<16x128xf32>
    %52 = vector.extract_strided_slice %45 {offsets = [0, 256], sizes = [16, 128], strides = [1, 1]} : vector<16x384xf32> to vector<16x128xf32>
    %53 = vector.broadcast %11 : vector<1x128xf32> to vector<16x128xf32>
    %54 = arith.addf %52, %53 : vector<16x128xf32>
    %55 = tpu.iota {dimensions = array<i32: 0>} : vector<8x8xi32>
    %56 = tpu.iota {dimensions = array<i32: 1>} : vector<8x8xi32>
    %57 = arith.cmpi sle, %56, %55 : vector<8x8xi32>
    %58 = vector.shape_cast %57 : vector<8x8xi1> to vector<1x8x8xi1>
    %59 = vector.extract_strided_slice %48 {offsets = [0, 0], sizes = [16, 16], strides = [1, 1]} : vector<16x128xf32> to vector<16x16xf32>
    %60 = vector.shape_cast %59 : vector<16x16xf32> to vector<2x8x16xf32>
    %61 = vector.extract_strided_slice %51 {offsets = [0, 0], sizes = [16, 16], strides = [1, 1]} : vector<16x128xf32> to vector<16x16xf32>
    %62 = vector.shape_cast %61 : vector<16x16xf32> to vector<2x8x16xf32>
    %63 = vector.extract_strided_slice %54 {offsets = [0, 0], sizes = [16, 16], strides = [1, 1]} : vector<16x128xf32> to vector<16x16xf32>
    %64 = vector.shape_cast %63 : vector<16x16xf32> to vector<2x8x16xf32>
    "tpu.trace_start"() <{level = 10 : i32, message = "bqd,bkd->bqk"}> : () -> ()
    %cst_13 = arith.constant dense<0.000000e+00> : vector<2x8x8xf32>
    %65 = tpu.matmul %60, %62, %cst_13 {dimension_numbers = #tpu.dot_dimension_numbers<[2], [2], [1], [1], [0, 0, 0, 1, 1, 1], [0], [0]>} : vector<2x8x16xf32>, vector<2x8x16xf32>, vector<2x8x8xf32> -> vector<2x8x8xf32>
    %cst_14 = arith.constant -1.000000e+30 : f32
    "tpu.trace_stop"() : () -> ()
    %66 = vector.shape_cast %58 : vector<1x8x8xi1> to vector<1x8x8xi1>
    %67 = vector.broadcast %66 : vector<1x8x8xi1> to vector<2x8x8xi1>
    %68 = vector.broadcast %cst_14 : f32 to vector<2x8x8xf32>
    %69 = arith.select %67, %65, %68 : vector<2x8x8xi1>, vector<2x8x8xf32>
    %cst_15 = arith.constant dense<0xFF800000> : vector<2x8xf32>
    %70 = vector.multi_reduction <maximumf>, %69, %cst_15 [2] : vector<2x8x8xf32> to vector<2x8xf32>
    %71 = vector.shape_cast %70 : vector<2x8xf32> to vector<2x8x1xf32>
    %72 = vector.broadcast %71 : vector<2x8x1xf32> to vector<2x8x8xf32>
    %73 = arith.subf %69, %72 : vector<2x8x8xf32>
    %74 = math.exp %73 : vector<2x8x8xf32>
    %cst_16 = arith.constant dense<0.000000e+00> : vector<2x8xf32>
    %75 = vector.multi_reduction <add>, %74, %cst_16 [2] : vector<2x8x8xf32> to vector<2x8xf32>
    %76 = vector.shape_cast %75 : vector<2x8xf32> to vector<2x8x1xf32>
    "tpu.trace_start"() <{level = 10 : i32, message = "bqk,bkd->bqd"}> : () -> ()
    %cst_17 = arith.constant dense<0.000000e+00> : vector<2x8x16xf32>
    %77 = tpu.matmul %74, %64, %cst_17 {dimension_numbers = #tpu.dot_dimension_numbers<[2], [1], [1], [2], [0, 0, 0, 1, 1, 2], [0], [0]>} : vector<2x8x8xf32>, vector<2x8x16xf32>, vector<2x8x16xf32> -> vector<2x8x16xf32>
    "tpu.trace_stop"() : () -> ()
    %78 = tpu.reciprocal %76 {approx = true} : vector<2x8x1xf32> -> vector<2x8x1xf32>
    %79 = vector.broadcast %78 : vector<2x8x1xf32> to vector<2x8x16xf32>
    %80 = arith.mulf %77, %79 : vector<2x8x16xf32>
    %81 = vector.shape_cast %80 : vector<2x8x16xf32> to vector<16x16xf32>
    %82 = vector.extract_strided_slice %48 {offsets = [0, 16], sizes = [16, 16], strides = [1, 1]} : vector<16x128xf32> to vector<16x16xf32>
    %83 = vector.shape_cast %82 : vector<16x16xf32> to vector<2x8x16xf32>
    %84 = vector.extract_strided_slice %51 {offsets = [0, 16], sizes = [16, 16], strides = [1, 1]} : vector<16x128xf32> to vector<16x16xf32>
    %85 = vector.shape_cast %84 : vector<16x16xf32> to vector<2x8x16xf32>
    %86 = vector.extract_strided_slice %54 {offsets = [0, 16], sizes = [16, 16], strides = [1, 1]} : vector<16x128xf32> to vector<16x16xf32>
    %87 = vector.shape_cast %86 : vector<16x16xf32> to vector<2x8x16xf32>
    "tpu.trace_start"() <{level = 10 : i32, message = "bqd,bkd->bqk"}> : () -> ()
    %cst_18 = arith.constant dense<0.000000e+00> : vector<2x8x8xf32>
    %88 = tpu.matmul %83, %85, %cst_18 {dimension_numbers = #tpu.dot_dimension_numbers<[2], [2], [1], [1], [0, 0, 0, 1, 1, 1], [0], [0]>} : vector<2x8x16xf32>, vector<2x8x16xf32>, vector<2x8x8xf32> -> vector<2x8x8xf32>
    %cst_19 = arith.constant -1.000000e+30 : f32
    "tpu.trace_stop"() : () -> ()
    %89 = vector.shape_cast %58 : vector<1x8x8xi1> to vector<1x8x8xi1>
    %90 = vector.broadcast %89 : vector<1x8x8xi1> to vector<2x8x8xi1>
    %91 = vector.broadcast %cst_19 : f32 to vector<2x8x8xf32>
    %92 = arith.select %90, %88, %91 : vector<2x8x8xi1>, vector<2x8x8xf32>
    %cst_20 = arith.constant dense<0xFF800000> : vector<2x8xf32>
    %93 = vector.multi_reduction <maximumf>, %92, %cst_20 [2] : vector<2x8x8xf32> to vector<2x8xf32>
    %94 = vector.shape_cast %93 : vector<2x8xf32> to vector<2x8x1xf32>
    %95 = vector.broadcast %94 : vector<2x8x1xf32> to vector<2x8x8xf32>
    %96 = arith.subf %92, %95 : vector<2x8x8xf32>
    %97 = math.exp %96 : vector<2x8x8xf32>
    %cst_21 = arith.constant dense<0.000000e+00> : vector<2x8xf32>
    %98 = vector.multi_reduction <add>, %97, %cst_21 [2] : vector<2x8x8xf32> to vector<2x8xf32>
    %99 = vector.shape_cast %98 : vector<2x8xf32> to vector<2x8x1xf32>
    "tpu.trace_start"() <{level = 10 : i32, message = "bqk,bkd->bqd"}> : () -> ()
    %cst_22 = arith.constant dense<0.000000e+00> : vector<2x8x16xf32>
    %100 = tpu.matmul %97, %87, %cst_22 {dimension_numbers = #tpu.dot_dimension_numbers<[2], [1], [1], [2], [0, 0, 0, 1, 1, 2], [0], [0]>} : vector<2x8x8xf32>, vector<2x8x16xf32>, vector<2x8x16xf32> -> vector<2x8x16xf32>
    "tpu.trace_stop"() : () -> ()
    %101 = tpu.reciprocal %99 {approx = true} : vector<2x8x1xf32> -> vector<2x8x1xf32>
    %102 = vector.broadcast %101 : vector<2x8x1xf32> to vector<2x8x16xf32>
    %103 = arith.mulf %100, %102 : vector<2x8x16xf32>
    %104 = vector.shape_cast %103 : vector<2x8x16xf32> to vector<16x16xf32>
    %cst_23 = arith.constant 0.000000e+00 : f32
    %105 = vector.broadcast %cst_23 : f32 to vector<16x96xf32>
    %106 = tpu.concatenate %81, %104, %105 in 1 : vector<16x16xf32>, vector<16x16xf32>, vector<16x96xf32> -> vector<16x128xf32>
    %107 = arith.truncf %106 : vector<16x128xf32> to vector<16x128xbf16>
    %cst_24 = arith.constant dense<0.000000e+00> : vector<16x128xf32>
    %108 = tpu.matmul %107, %18, %cst_24 {dimension_numbers = #tpu.dot_dimension_numbers<[1], [0], [0], [1], [0, 0, 1, 1], [], []>} : vector<16x128xbf16>, vector<128x128xbf16>, vector<16x128xf32> -> vector<16x128xf32>
    %109 = arith.addf %21, %108 : vector<16x128xf32>
    %110 = vector.broadcast %12 : vector<1x128xf32> to vector<16x128xf32>
    %111 = arith.addf %109, %110 : vector<16x128xf32>
    %cst_25 = arith.constant dense<0.000000e+00> : vector<16xf32>
    %112 = vector.multi_reduction <add>, %111, %cst_25 [1] : vector<16x128xf32> to vector<16xf32>
    %113 = vector.shape_cast %112 : vector<16xf32> to vector<16x1xf32>
    %cst_26 = arith.constant 3.125000e-02 : f32
    %114 = vector.broadcast %cst_26 : f32 to vector<16x1xf32>
    %115 = arith.mulf %113, %114 : vector<16x1xf32>
    %116 = arith.mulf %111, %111 : vector<16x128xf32>
    %cst_27 = arith.constant dense<0.000000e+00> : vector<16xf32>
    %117 = vector.multi_reduction <add>, %116, %cst_27 [1] : vector<16x128xf32> to vector<16xf32>
    %118 = vector.shape_cast %117 : vector<16xf32> to vector<16x1xf32>
    %cst_28 = arith.constant 3.125000e-02 : f32
    %119 = vector.broadcast %cst_28 : f32 to vector<16x1xf32>
    %120 = arith.mulf %118, %119 : vector<16x1xf32>
    %121 = arith.mulf %115, %115 : vector<16x1xf32>
    %122 = arith.subf %120, %121 : vector<16x1xf32>
    %cst_29 = arith.constant 9.99999974E-6 : f32
    %123 = vector.broadcast %cst_29 : f32 to vector<16x1xf32>
    %124 = arith.addf %122, %123 : vector<16x1xf32>
    %125 = math.rsqrt %124 : vector<16x1xf32>
    %126 = vector.broadcast %115 : vector<16x1xf32> to vector<16x128xf32>
    %127 = arith.subf %111, %126 : vector<16x128xf32>
    %128 = vector.broadcast %125 : vector<16x1xf32> to vector<16x128xf32>
    %129 = arith.mulf %127, %128 : vector<16x128xf32>
    %130 = vector.broadcast %13 : vector<1x128xf32> to vector<16x128xf32>
    %131 = arith.mulf %129, %130 : vector<16x128xf32>
    %132 = vector.broadcast %14 : vector<1x128xf32> to vector<16x128xf32>
    %133 = arith.addf %131, %132 : vector<16x128xf32>
    %134 = arith.truncf %133 : vector<16x128xf32> to vector<16x128xbf16>
    %cst_30 = arith.constant dense<0.000000e+00> : vector<16x128xf32>
    %135 = tpu.matmul %134, %19, %cst_30 {dimension_numbers = #tpu.dot_dimension_numbers<[1], [0], [0], [1], [0, 0, 1, 1], [], []>} : vector<16x128xbf16>, vector<128x128xbf16>, vector<16x128xf32> -> vector<16x128xf32>
    %136 = vector.broadcast %15 : vector<1x128xf32> to vector<16x128xf32>
    %137 = arith.addf %135, %136 : vector<16x128xf32>
    %cst_31 = arith.constant 1.702000e+00 : f32
    %138 = vector.broadcast %cst_31 : f32 to vector<16x128xf32>
    %139 = arith.mulf %138, %137 : vector<16x128xf32>
    %140 = arith.negf %139 : vector<16x128xf32>
    %141 = math.exp %140 : vector<16x128xf32>
    %cst_32 = arith.constant 1.000000e+00 : f32
    %142 = vector.broadcast %cst_32 : f32 to vector<16x128xf32>
    %143 = arith.addf %142, %141 : vector<16x128xf32>
    %144 = arith.divf %142, %143 : vector<16x128xf32>
    %145 = arith.mulf %137, %144 : vector<16x128xf32>
    %146 = arith.truncf %145 : vector<16x128xf32> to vector<16x128xbf16>
    %cst_33 = arith.constant dense<0.000000e+00> : vector<16x128xf32>
    %147 = tpu.matmul %146, %20, %cst_33 {dimension_numbers = #tpu.dot_dimension_numbers<[1], [0], [0], [1], [0, 0, 1, 1], [], []>} : vector<16x128xbf16>, vector<128x128xbf16>, vector<16x128xf32> -> vector<16x128xf32>
    %148 = arith.addf %111, %147 : vector<16x128xf32>
    %149 = vector.broadcast %16 : vector<1x128xf32> to vector<16x128xf32>
    %150 = arith.addf %148, %149 : vector<16x128xf32>
    %c0_34 = arith.constant 0 : index
    %c0_35 = arith.constant 0 : index
    %151 = vector.load %arg6[%c0_34, %c0_35] : memref<16x128xf32, #tpu.memory_space<vmem>>, vector<16x128xf32>
    tpu.vector_store %arg6[%c0_34, %c0_35], %150 {strides = array<i32>} : memref<16x128xf32, #tpu.memory_space<vmem>>, vector<16x128xf32>,
    %c1_i32 = arith.constant 1 : i32
    %152 = arith.cmpi eq, %arg0, %c1_i32 : i32
    %153 = arith.extui %152 : i1 to i32
    %c0_i32_36 = arith.constant 0 : i32
    %154 = arith.cmpi ne, %153, %c0_i32_36 : i32
    scf.if %154 {
      %c0_37 = arith.constant 0 : index
      %c0_38 = arith.constant 0 : index
      %155 = vector.load %arg4[%c0_37, %c0_38] : memref<8x128xf32, #tpu.memory_space<vmem>>, vector<1x128xf32>
      %c1 = arith.constant 1 : index
      %c0_39 = arith.constant 0 : index
      %156 = vector.load %arg4[%c1, %c0_39] : memref<8x128xf32, #tpu.memory_space<vmem>>, vector<1x128xf32>
      %cst_40 = arith.constant dense<0.000000e+00> : vector<16xf32>
      %157 = vector.multi_reduction <add>, %150, %cst_40 [1] : vector<16x128xf32> to vector<16xf32>
      %158 = vector.shape_cast %157 : vector<16xf32> to vector<16x1xf32>
      %cst_41 = arith.constant 3.125000e-02 : f32
      %159 = vector.broadcast %cst_41 : f32 to vector<16x1xf32>
      %160 = arith.mulf %158, %159 : vector<16x1xf32>
      %161 = arith.mulf %150, %150 : vector<16x128xf32>
      %cst_42 = arith.constant dense<0.000000e+00> : vector<16xf32>
      %162 = vector.multi_reduction <add>, %161, %cst_42 [1] : vector<16x128xf32> to vector<16xf32>
      %163 = vector.shape_cast %162 : vector<16xf32> to vector<16x1xf32>
      %cst_43 = arith.constant 3.125000e-02 : f32
      %164 = vector.broadcast %cst_43 : f32 to vector<16x1xf32>
      %165 = arith.mulf %163, %164 : vector<16x1xf32>
      %166 = arith.mulf %160, %160 : vector<16x1xf32>
      %167 = arith.subf %165, %166 : vector<16x1xf32>
      %cst_44 = arith.constant 9.99999974E-6 : f32
      %168 = vector.broadcast %cst_44 : f32 to vector<16x1xf32>
      %169 = arith.addf %167, %168 : vector<16x1xf32>
      %170 = math.rsqrt %169 : vector<16x1xf32>
      %171 = vector.broadcast %160 : vector<16x1xf32> to vector<16x128xf32>
      %172 = arith.subf %150, %171 : vector<16x128xf32>
      %173 = vector.broadcast %170 : vector<16x1xf32> to vector<16x128xf32>
      %174 = arith.mulf %172, %173 : vector<16x128xf32>
      %175 = vector.broadcast %155 : vector<1x128xf32> to vector<16x128xf32>
      %176 = arith.mulf %174, %175 : vector<16x128xf32>
      %177 = vector.broadcast %156 : vector<1x128xf32> to vector<16x128xf32>
      %178 = arith.addf %176, %177 : vector<16x128xf32>
      %c0_45 = arith.constant 0 : index
      %c0_46 = arith.constant 0 : index
      %179 = vector.load %arg5[%c0_45, %c0_46] : memref<16x128xf32, #tpu.memory_space<vmem>>, vector<16x128xf32>
      tpu.vector_store %arg5[%c0_45, %c0_46], %178 {strides = array<i32>} : memref<16x128xf32, #tpu.memory_space<vmem>>, vector<16x128xf32>,
    } else {
    }
    return
  }
  func.func @transform_0(%arg0: i32) -> (i32, i32) {
    %c0_i32 = arith.constant 0 : i32
    %c0_i32_0 = arith.constant 0 : i32
    %c0_i32_1 = arith.constant 0 : i32
    return %c0_i32, %c0_i32_0 : i32, i32
  }
  func.func @transform_1(%arg0: i32) -> (i32, i32, i32) {
    %c0_i32 = arith.constant 0 : i32
    %c0_i32_0 = arith.constant 0 : i32
    %c0_i32_1 = arith.constant 0 : i32
    return %arg0, %c0_i32, %c0_i32_0 : i32, i32, i32
  }
  func.func @transform_2(%arg0: i32) -> (i32, i32, i32) {
    %c0_i32 = arith.constant 0 : i32
    %c0_i32_0 = arith.constant 0 : i32
    %c0_i32_1 = arith.constant 0 : i32
    return %arg0, %c0_i32, %c0_i32_0 : i32, i32, i32
  }
  func.func @transform_3(%arg0: i32) -> (i32, i32) {
    %c0_i32 = arith.constant 0 : i32
    %c0_i32_0 = arith.constant 0 : i32
    %c0_i32_1 = arith.constant 0 : i32
    return %c0_i32, %c0_i32_0 : i32, i32
  }
  func.func @transform_4(%arg0: i32) -> (i32, i32) {
    %c0_i32 = arith.constant 0 : i32
    %c0_i32_0 = arith.constant 0 : i32
    %c0_i32_1 = arith.constant 0 : i32
    return %c0_i32, %c0_i32_0 : i32, i32
  }
}

</mosaic_0001>

<bundles_post_ra>
// kernel: custom-call.2
= control target key start
LH: loop header
LB: loop body
LE: loop exit
PB: predicated region body
PF: predicated region fallthrough
CT: control target
= control target key end

     0   :  { %s6_s0 = inlined_call_operand.vmem [shape: bf16[2,32], index: 0, kind: output, shape index: {}]  }

// kernel: encode_text.1
= control target key start
LH: loop header
LB: loop body
LE: loop exit
PB: predicated region body
PF: predicated region fallthrough
CT: control target
= control target key end

     0   :  { %9 = vsyncpa [#allocation4], 0  ;;  %s2509_s0 = inlined_call_operand.vmem [shape: f32[16,128], index: 0, kind: input, shape index: {}]   ;;  %s2510_s1 = inlined_call_operand.hbm [shape: bf16[2,128,768], index: 1, kind: input, shape index: {}]   ;;  %s2511_s2 = inlined_call_operand.vmem [shape: f32[2,16,128], index: 2, kind: input, shape index: {}]   ;;  %s2512_s3 = inlined_call_operand.vmem [shape: f32[8,128], index: 3, kind: input, shape index: {}]   ;;  %s2513_s4 = inlined_call_operand.vmem [shape: f32[16,128], index: 4, kind: output, shape index: {}]  }
   0x1   :  { %11 = vsyncpa [#allocation4 + $0x1], 0  ;;  %s2154_s15 = smov 0   ;;  %s2156_s16 = smov 0  }
   0x2   :  { %s2158_s17 = smov 0   ;;  %s2160_s18 = smov 0  }
   0x3 LB: > { %s2173_s19 = sadd.s32 4294967295, %s2119_s18   ;;  %s2176_s20 = sadd.s32 1, %s2119_s18   ;;  %s2119_s18 = sphi %s2160_s18, %s2520_s18   ;;  %s2115_s17 = sphi %s2158_s17, %s2519_s17   ;;  %s2111_s16 = sphi %s2156_s16, %s2518_s16   ;;  %s2107_s15 = sphi %s2154_s15, %s2517_s15  }
   0x4   : > { %s42_s21 = ssub.s32 %s2119_s18, %s2176_s20  ;;  %s45_s22 = sadd.s32 1, %s2115_s17 }
   0x5   : > { %p43_p0 = scmp.eq.s32.totalorder %s42_s21, 0  ;;  %p52_p1 = scmp.ne.s32.totalorder %s2115_s17, %s2111_s16 }
   0x6   : > { %p53_p2 = scmp.eq.s32.totalorder %s2119_s18, 0  ;;  %p58_p3 = scmp.ne.s32.totalorder %s2111_s16, %s2107_s15 }
   0x7   : > { %s2186_s23 = scalar_select %p43_p0, %s2115_s17, %s45_s22  }
   0x8   : > { %p54_p4 = por %p53_p2, %p52_p1  ;;  %p59_p5 = scmp.eq.s32.totalorder %s2173_s19, 0 }
   0x9   : > { %p1902_p6 = scmp.lt.s32.totalorder %s2119_s18, 2  ;;  %s156_s25 = sand.u32 1, %s2115_s17  }
   0xa   : > { %p2190_p7 = por %p59_p5, %p58_p3  ;;  %s1893_s26 = smul.u32 384, %s156_s25 }
   0xb   : > { %s1894_s27 = smul.u32 6144, %s2119_s18  ;;  %p2196_p8 = pnand %p1902_p6, %p54_p4 }
   0xc   : > { %s160_s6 = scalar_lea.vmem [#allocation3], %s1893_s26  ;;  %s2208_s8 = scalar_lea.sflag [#allocation4], %s156_s25 }
   0xd   : > { %s2203_s5 = scalar_lea.hbm %s2510_s1, %s1894_s27  ;;  %s167_s7 = sshll.u32 %s160_s6, 4  ;;  %s2205_s7 = int_to_ptr.vmem [resolvable:$true] %s167_s7 }
   0xe   : > { %s2055_s9 = scalar_lea.hbm %s2203_s5, 6144  ;;  %p2057_p11 = pneg %p2196_p8 }
   0xf   : > { %p2056_p10 = scmp.ne.s32.totalorder %s2203_s5, %s2055_s9  ;;  %s2060_s12 = scalar_lea.hbm %s2510_s1, 12288 }
  0x10   : > { %p2061_p0 = scmp.lt.u32.totalorder %s2203_s5, %s2510_s1  ;;  %p2062_p1 = scmp.lt.u32.totalorder %s2060_s12, %s2055_s9 }
  0x11   : > { %p2058_p12 = pnand %p2057_p11, %p2056_p10  ;;  %p2064_p3 = scmp.lt.u32.totalorder %s2055_s9, %s2203_s5 }
  0x12   : > { %p2063_p2 = por %p2062_p1, %p2061_p0 }
  0x13   : > { %p2059_p13 = pneg %p2058_p12 }
  0x14   : > { %p2065_p4 = por %p2064_p3, %p2063_p2 }
  0x16   : > { %p2066_p5 = pnand %p2065_p4, %p2059_p13 }
  0x18   : > { %2069 = shalt.err (!%p2066_p5)
}
  0x19   : > { %s2070_s15 = scalar_lea.vmem %s2205_s7, 6144  ;;  %s2121_s21 = smov [#allocation3]  }
  0x1a   : > { %p2071_p6 = scmp.ne.s32.totalorder %s2205_s7, %s2070_s15  ;;  %s2075_s22 = sshll.u32 %s2121_s21, 4  ;;  %s2076_s22 = int_to_ptr.vmem [resolvable:$false] %s2075_s22 }
  0x1b   : > { %s2077_s25 = scalar_lea.vmem %s2076_s22, 12288  ;;  %p2078_p9 = scmp.lt.s32.totalorder %s2205_s7, %s2076_s22 }
  0x1c   : > { %p2073_p10 = pnand %p2071_p6, %p2057_p11  ;;  %p2079_p0 = scmp.lt.s32.totalorder %s2077_s25, %s2070_s15 }
  0x1e   : > { %p2074_p12 = pneg %p2073_p10  ;;  %p2080_p1 = por %p2079_p0, %p2078_p9 }
  0x20   : > { %p2081_p2 = pnand %p2080_p1, %p2074_p12 }
  0x22   : > { %2084 = shalt.err (!%p2081_p2)
}
  0x23   : > { %s2122_s26 = smov 384   ;;  %s2123_s27 = smov 24  }
  0x24   : > { %1901 = dma.hbm_to_vmem [thread:$0]  (!%p2196_p8), %s2203_s5, 6144, %s2205_s7, %s2208_s8, %s2122_s26, %s2122_s26, %s2123_s27  }
  0x25   : > { %p183_p11 = scmp.lt.s32.totalorder %s2119_s18, 3  ;;  %p2516_p13 = scmp.ge.s32.totalorder %s2119_s18, 1 }
  0x27   : > { %p184_p3 = pnand %p2516_p13, %p183_p11 }
  0x28   : > { %s189_s29 = sand.u32 (!%p184_p3), 1, %s2111_s16  }
  0x29   : > { %187 = sbr.rel (%p184_p3) target bundleno = 2575 (0xa0f), region = 36  ;;  %s190_s6 = scalar_lea.sflag (!%p184_p3), [#allocation4], %s189_s29 }
  0x2a   : > { %s1895_s30 = smul.u32 (!%p184_p3), 384, %s189_s29 }
  0x2c   : > { %s2240_s9 = scalar_lea.vmem (!%p184_p3), [#allocation3], %s1895_s30 }
  0x30   : > { %2102 = dma.done.wait (%p2190_p7), %s190_s6, 6144  }
  0x31   : > { %2104 = vsyncadd (%p2190_p7), %s190_s6, 4294961152  ;;  %p218_p9 = scmp.lt.s32.totalorder %s2173_s19, 1  ;;  %p1649_p8 = scmp.ne.s32.totalorder %s2173_s19, 0 }
  0x32   : > { %v228_v0 = vld [vmem:[%s2509_s0] sm:$0xff] (!%p1649_p8)  ;;  %v229_v1 = vld [vmem:[%s2509_s0 + $0x8] sm:$0xff] (!%p1649_p8) }
  0x33   : > { %s219_s28 = scalar_select %p218_p9, %s2173_s19, 1 }
  0x34   : > { %227 = sbr.rel (%p1649_p8) target bundleno = 59 (0x3b), region = 44  ;;  %230 = vst [vmem:[#allocation2] sm:$0xff] (!%p1649_p8), %v228_v0  ;;  %231 = vst [vmem:[#allocation2 + $0x8] sm:$0xff] (!%p1649_p8), %v229_v1 }
  0x35   : > { %s1720_s5 = sshll.u32 %s219_s28, 4 }
  0x36   : > { %s2251_s8 = scalar_lea.vmem %s2511_s2, %s1720_s5 }
  0x3b PF: > { %v2260_v2 = vld [vmem:[#allocation2] sm:$0xff]  ;;  %v2262_v3 = vld [vmem:[#allocation2 + $0x8] sm:$0xff]  ;;  %v2124_v5 = vmov 0.0   ;;  %v1950_v9 = vld [vmem:[%s2240_s9 + $0x8] ss:$24 sps:$4 sm:$0xff]   ;;  %v2125_v26 = vmov 0   ;;  %v310_v44 = vlaneseq }
  0x3c   : > { %284 = vadd.xlane.f32.xlu0 %v2260_v2  ;;  %v290_v4 = vmul.f32 %v2260_v2, %v2260_v2  ;;  %1773 = vmatprep.subr.bf16.mxu1 %v2124_v5  ;;  %v291_v6 = vmul.f32 %v2262_v3, %v2262_v3  ;;  %v1947_v7 = vld [vmem:[%s2240_s9 + $0x4] ss:$24 sps:$4 sm:$0xff]   ;;  %v1949_v8 = vld [vmem:[%s2240_s9] ss:$24 sps:$4 sm:$0xff]   ;;  %v1953_v10 = vld [vmem:[%s2240_s9 + $0x34] ss:$24 sps:$4 sm:$0xff]  }
  0x3d   : > { %451 = vmatprep.subr.bf16.mxu0 %v1947_v7  ;;  %1774 = vmatpush3.bf16.msra.mxu1 %v1950_v9  ;;  %v1955_v11 = vld [vmem:[%s2240_s9 + $0x30] ss:$24 sps:$4 sm:$0xff]   ;;  %v1959_v13 = vld [vmem:[%s2240_s9 + $0x64] ss:$24 sps:$4 sm:$0xff]   ;;  %v1961_v14 = vld [vmem:[%s2240_s9 + $0x60] ss:$24 sps:$4 sm:$0xff]  }
  0x3e   : > { %292 = vadd.xlane.f32.xlu1 %v290_v4  ;;  %452 = vmatpush1.bf16.msra.mxu0 %v1949_v8  ;;  %v1956_v12 = vld [vmem:[%s2240_s9 + $0x38] ss:$24 sps:$4 sm:$0xff]   ;;  %v1962_v15 = vld [vmem:[%s2240_s9 + $0x68] ss:$24 sps:$4 sm:$0xff]   ;;  %v1965_v16 = vld [vmem:[%s2240_s9 + $0x94] ss:$24 sps:$4 sm:$0xff]  }
  0x3f   : > { %1775 = vmatprep.subr.bf16.mxu1 %v2124_v5  ;;  %453 = vmatprep.subr.bf16.mxu0 %v1953_v10  ;;  %v1967_v17 = vld [vmem:[%s2240_s9 + $0x90] ss:$24 sps:$4 sm:$0xff]   ;;  %v1971_v19 = vld [vmem:[%s2240_s9 + $0xc4] ss:$24 sps:$4 sm:$0xff]   ;;  %v1973_v20 = vld [vmem:[%s2240_s9 + $0xc0] ss:$24 sps:$4 sm:$0xff]  }
  0x40   : > { %286 = vadd.xlane.f32.xlu0 %v2262_v3  ;;  %v1968_v18 = vld [vmem:[%s2240_s9 + $0x98] ss:$24 sps:$4 sm:$0xff]   ;;  %v1974_v21 = vld [vmem:[%s2240_s9 + $0xc8] ss:$24 sps:$4 sm:$0xff]   ;;  %v1977_v22 = vld [vmem:[%s2240_s9 + $0xf4] ss:$24 sps:$4 sm:$0xff]   ;;  %483 = vmatprep.mubr.bf16.mxu0 %v2125_v26 }
  0x41   : > { %1776 = vmatpush3.bf16.msra.mxu1 %v1956_v12  ;;  %v1979_v23 = vld [vmem:[%s2240_s9 + $0xf0] ss:$24 sps:$4 sm:$0xff]   ;;  %v1983_v25 = vld [vmem:[%s2240_s9 + $0x124] ss:$24 sps:$4 sm:$0xff]   ;;  %vm2126_vm0 = vmmov 0   ;;  %v2307_v47 = vshrl.u32 %v310_v44, 7 }
  0x42   : > { %294 = vadd.xlane.f32.xlu1 %v291_v6  ;;  %454 = vmatpush1.bf16.msra.mxu0 %v1955_v11  ;;  %v1980_v24 = vld [vmem:[%s2240_s9 + $0xf8] ss:$24 sps:$4 sm:$0xff]   ;;  %v1986_v28 = vld [vmem:[%s2240_s9 + $0x128] ss:$24 sps:$4 sm:$0xff]   ;;  %v1989_v29 = vld [vmem:[%s2240_s9 + $0x154] ss:$24 sps:$4 sm:$0xff]  }
  0x43   : > { %1777 = vmatprep.subr.bf16.mxu1 %v2124_v5  ;;  %455 = vmatprep.subr.bf16.mxu0 %v1959_v13  ;;  %v1985_v27 = vld [vmem:[%s2240_s9 + $0x120] ss:$24 sps:$4 sm:$0xff]   ;;  %v1991_v30 = vld [vmem:[%s2240_s9 + $0x150] ss:$24 sps:$4 sm:$0xff]   ;;  %v312_v48 = vsub.s32 0, %v2307_v47  ;;  %v318_v54 = vsub.s32 1, %v2307_v47 }
  0x44   : > { %1789 = vmatprep.mubr.msk.bf16.mxu1 %vm2126_vm0, %v2124_v5  ;;  %v1992_v31 = vld [vmem:[%s2240_s9 + $0x158] ss:$24 sps:$4 sm:$0xff]   ;;  %v1952_v63 = vld [vmem:[%s2240_s9 + $0xc] ss:$24 sps:$4 sm:$0xff]   ;;  %v1958_v1 = vld [vmem:[%s2240_s9 + $0x3c] ss:$24 sps:$4 sm:$0xff]  }
  0x45   : > { %1778 = vmatpush3.bf16.msra.mxu1 %v1962_v15  ;;  %v2311_v49 = vld [vmem:[%s2251_s8] sm:$0xff]  ;;  %v1964_v4 = vld [vmem:[%s2240_s9 + $0x6c] ss:$24 sps:$4 sm:$0xff]   ;;  %v537_v11 = vsub.s32 2, %v2307_v47  ;;  %v543_v12 = vsub.s32 3, %v2307_v47  ;;  %vm558_vm1 = vcmask 130048  }
  0x46   : > { %456 = vmatpush1.bf16.msra.mxu0 %v1961_v14  ;;  %1779 = vmatprep.subr.bf16.mxu1 %v2124_v5  ;;  %v313_v53 = vrot.slane %v2311_v49, %v312_v48  ;;  %v319_v59 = vrot.slane %v2311_v49, %v318_v54  ;;  %v1970_v6 = vld [vmem:[%s2240_s9 + $0x9c] ss:$24 sps:$4 sm:$0xff]   ;;  %v1976_v7 = vld [vmem:[%s2240_s9 + $0xcc] ss:$24 sps:$4 sm:$0xff]   ;;  %v549_v14 = vsub.s32 4, %v2307_v47  ;;  %s2127_s13 = smov 112  }
  0x47   : > { %457 = vmatprep.subr.bf16.mxu0 %v1965_v16  ;;  %v1982_v8 = vld [vmem:[%s2240_s9 + $0xfc] ss:$24 sps:$4 sm:$0xff]   ;;  %v1988_v9 = vld [vmem:[%s2240_s9 + $0x12c] ss:$24 sps:$4 sm:$0xff]   ;;  %v538_v13 = vrot.slane %v2311_v49, %v537_v11  ;;  %v544_v15 = vrot.slane %v2311_v49, %v543_v12  ;;  %vm715_vm3 = vcmask 64512   ;;  %s2128_s14 = smov 16  }
  0x48   : > { %v1994_v10 = vld [vmem:[%s2240_s9 + $0x15c] ss:$24 sps:$4 sm:$0xff]   ;;  %vm1228_vm4 = vcmask 261120   ;;  %p1715_p7 = scmp.ne.s32.totalorder %s2173_s19, 1 }
  0x49   : > { %1780 = vmatpush3.bf16.msra.mxu1 %v1968_v18  ;;  %vm1694_vm5 = vmpackc.low %vm1228_vm4, %vm1228_vm4 }
  0x4a   : > { %458 = vmatpush1.bf16.msra.mxu0 %v1967_v17  ;;  %1781 = vmatprep.subr.bf16.mxu1 %v2124_v5 }
  0x4b   : > { %459 = vmatprep.subr.bf16.mxu0 %v1971_v19  ;;  %v550_v19 = vrot.slane %v2311_v49, %v549_v14 }
  0x4d   : > { %1782 = vmatpush3.bf16.msra.mxu1 %v1974_v21 }
  0x4e   : > { %460 = vmatpush1.bf16.msra.mxu0 %v1973_v20  ;;  %1783 = vmatprep.subr.bf16.mxu1 %v2124_v5 }
  0x4f   : > { %461 = vmatprep.subr.bf16.mxu0 %v1977_v22 }
  0x51   : > { %1784 = vmatpush3.bf16.msra.mxu1 %v1980_v24 }
  0x52   : > { %462 = vmatpush1.bf16.msra.mxu0 %v1979_v23  ;;  %1785 = vmatprep.subr.bf16.mxu1 %v2124_v5 }
  0x53   : > { %463 = vmatprep.subr.bf16.mxu0 %v1983_v25 }
  0x55   : > { %1786 = vmatpush3.bf16.msra.mxu1 %v1986_v28 }
  0x56   : > { %464 = vmatpush1.bf16.msra.mxu0 %v1985_v27  ;;  %1787 = vmatprep.subr.bf16.mxu1 %v2124_v5 }
  0x57   : > { %465 = vmatprep.subr.bf16.mxu0 %v1989_v29 }
  0x59   : > { %1788 = vmatpush3.bf16.msra.mxu1 %v1992_v31  ;;  %v556_v31 = vand.u32 127, %v310_v44 }
  0x5a   : > { %466 = vmatpush1.bf16.msra.mxu0 %v1991_v30  ;;  %1793 = vmatprep.subr.mxu1 %v2124_v5 }
  0x5b   : > { %1833 = vmatprep.subr.bf16.mxu0 %v2124_v5  ;;  %vm557_vm2 = vcmp.le.s32.totalorder %v556_v31, %v2307_v47 }
  0xc9   : > { %v285_v32 = vpop.xlane.xlu0 %284 }
  0xca   : > { %v288_v33 = vmul.f32 0.03125, %v285_v32 }
  0xcb   : > { %v293_v34 = vpop.xlane.xlu1 %292 }
  0xcc   : > { %v298_v35 = vmul.f32 %v288_v33, %v288_v33  ;;  %v296_v36 = vmul.f32 0.03125, %v293_v34  ;;  %v306_v50 = vsub.f32 %v2260_v2, %v288_v33 }
  0xcd   : > { %v287_v37 = vpop.xlane.xlu0 %286 }
  0xce   : > { %v300_v38 = vsub.f32 %v296_v36, %v298_v35  ;;  %v289_v39 = vmul.f32 0.03125, %v287_v37 }
  0xcf   : > { %v295_v40 = vpop.xlane.xlu1 %294 }
  0xd0   : > { %v302_v41 = vadd.f32 1e-05, %v300_v38  ;;  %v299_v42 = vmul.f32 %v289_v39, %v289_v39  ;;  %v297_v43 = vmul.f32 0.03125, %v295_v40  ;;  %v307_v55 = vsub.f32 %v2262_v3, %v289_v39 }
  0xd2   : > { %2019 = vrsqrt.f32 %v302_v41  ;;  %v301_v45 = vsub.f32 %v297_v43, %v299_v42 }
  0xd4   : > { %v303_v46 = vadd.f32 1e-05, %v301_v45 }
  0xd6   : > { %2021 = vrsqrt.f32 %v303_v46 }
  0xdc   : > { %v2020_v51 = vpop.eup %2019 }
  0xdd   : > { %v308_v52 = vmul.f32 %v2020_v51, %v306_v50 }
  0xdf   : > { %v314_v58 = vmul.f32 %v313_v53, %v308_v52 }
  0xe0   : > { %v2022_v56 = vpop.eup %2021 }
  0xe1   : > { %v309_v57 = vmul.f32 %v2022_v56, %v307_v55  ;;  %v320_v61 = vadd.f32 %v319_v59, %v314_v58 }
  0xe3   : > { %v315_v60 = vmul.f32 %v313_v53, %v309_v57 }
  0xe5   : > { %v321_v62 = vadd.f32 %v319_v59, %v315_v60 }
  0xe7   : > { %v322_v0 = vpack.c.bf16 %v321_v62, %v320_v61 }
  0xe9   : > { %484 = vmatmul.mubr.bf16.vlgmr.msra.gmra.mrb[0].mxu0 %v322_v0  ;;  %1790 = vmatmul.mubr.bf16.vlgmr.msra.gmra.mrb[0].mxu1 %v322_v0 }
  0xea   : > { %1795 = vmatprep.mubr.msk.f32.mxu1 %vm2126_vm0, %v2124_v5  ;;  %1834 = vmatpush3.bf16.msra.mxu0 %v1952_v63 }
  0xeb   : > { %1835 = vmatprep.subr.bf16.mxu0 %v2124_v5  ;;  %1849 = vmatprep.mubr.msk.bf16.mxu0 %vm2126_vm0, %v2124_v5 }
  0xee   : > { %1836 = vmatpush3.bf16.msra.mxu0 %v1958_v1 }
  0xef   : > { %1837 = vmatprep.subr.bf16.mxu0 %v2124_v5 }
  0xf2   : > { %1838 = vmatpush3.bf16.msra.mxu0 %v1964_v4 }
  0xf3   : > { %1839 = vmatprep.subr.bf16.mxu0 %v2124_v5 }
  0xf6   : > { %1840 = vmatpush3.bf16.msra.mxu0 %v1970_v6 }
  0xf7   : > { %1841 = vmatprep.subr.bf16.mxu0 %v2124_v5 }
  0xfa   : > { %1842 = vmatpush3.bf16.msra.mxu0 %v1976_v7 }
  0xfb   : > { %1843 = vmatprep.subr.bf16.mxu0 %v2124_v5 }
  0xfe   : > { %1844 = vmatpush3.bf16.msra.mxu0 %v1982_v8 }
  0xff   : > { %1845 = vmatprep.subr.bf16.mxu0 %v2124_v5 }
 0x102   : > { %1846 = vmatpush3.bf16.msra.mxu0 %v1988_v9 }
 0x103   : > { %1847 = vmatprep.subr.bf16.mxu0 %v2124_v5 }
 0x106   : > { %1848 = vmatpush3.bf16.msra.mxu0 %v1994_v10 }
 0x107   : > { %1873 = vmatprep.subr.bf16.mxu0 %v2124_v5 }
 0x1bc   : > { %v485_v16 = vpop.f32.mrb[0].mxu0  ;;  %v528_v17 = vpop.f32.mrb[0].mxu1 }
 0x1bd   : > { %v539_v18 = vadd.f32 %v538_v13, %v485_v16  ;;  %v487_v20 = vpop.f32.mrb[1].mxu0  ;;  %v1791_v21 = vpop.f32.mrb[1].mxu1  ;;  %v2358_v30 = vadd.f32 %v550_v19, %v528_v17 }
 0x1be   : > { %v545_v22 = vadd.f32 %v544_v15, %v487_v20  ;;  %v489_v23 = vpop.f32.mrb[2].mxu0  ;;  %v531_v24 = vpop.f32.mrb[2].mxu1 }
 0x1bf   : > { %v2348_v25 = vadd.f32 %v550_v19, %v531_v24  ;;  %v1792_v26 = vpop.f32.mrb[3].mxu1  ;;  %884 = vrot.lane.b32.xlu1 %v539_v18, %s2127_s13  ;;  %v491_v27 = vpop.f32.mrb[3].mxu0  ;;  %v540_v29 = vadd.f32 %v538_v13, %v489_v23 }
 0x1c0   : > { %1794 = vmatpush3.xpose.msk.msra.mxu1 %vm558_vm1, %v545_v22  ;;  %v546_v28 = vadd.f32 %v544_v15, %v491_v27 }
 0x1c1   : > { %1798 = vmatprep.subr.mxu1 %v2124_v5 }
 0x1c3   : > { %1796 = vmatmul.mubr.msk.f32.vlgmr.msra.gmra.mrb[4].mxu1 %vm558_vm1, %v539_v18 }
 0x1c4   : > { %1799 = vmatpush3.xpose.msk.msra.mxu1 %vm558_vm1, %v546_v28  ;;  %1800 = vmatprep.mubr.msk.f32.mxu1 %vm2126_vm0, %v2124_v5 }
 0x1c5   : > { %1803 = vmatprep.subr.mxu1 %v2124_v5 }
 0x1c7   : > { %1801 = vmatmul.mubr.msk.f32.vlgmr.msra.gmra.mrb[6].mxu1 %vm558_vm1, %v540_v29 }
 0x1c8   : > { %1804 = vmatpush3.msra.mxu1 %v2358_v30  ;;  %1805 = vmatprep.mubr.msk.f32.mxu1 %vm2126_vm0, %v2124_v5 }
 0x1c9   : > { %1808 = vmatprep.subr.mxu1 %v2124_v5 }
 0x231   : > { %v885_v40 = vpop.permute.xlu1 %884 }
 0x296   : > { %v631_v32 = vpop.f32.mrb[4].mxu1 }
 0x297   : > { %v713_v33 = vsel %vm557_vm2, %v631_v32, -1e+30  ;;  %v1797_v34 = vpop.f32.mrb[5].mxu1 }
 0x298   : > { %v716_v35 = vsel %vm715_vm3, %v713_v33, -inf }
 0x299   : > { %717 = vmax.xlane.f32.xlu0 %v716_v35 }
 0x29a   : > { %v707_v36 = vpop.f32.mrb[6].mxu1 }
 0x29b   : > { %v714_v37 = vsel %vm557_vm2, %v707_v36, -1e+30  ;;  %v1802_v38 = vpop.f32.mrb[7].mxu1 }
 0x29c   : > { %v719_v39 = vsel %vm715_vm3, %v714_v37, -inf }
 0x29d   : > { %720 = vmax.xlane.f32.xlu1 %v719_v39 }
 0x2ae   : > { %964 = vrot.lane.b32.xlu1 %v546_v28, %s2127_s13 }
 0x2af   : > { %886 = vrot.lane.b32.xlu0 %v545_v22, %s2127_s13 }
 0x2b2   : > { %962 = vrot.lane.b32.xlu1 %v540_v29, %s2127_s13 }
 0x326   : > { %v718_v41 = vpop.xlane.xlu0 %717 }
 0x327   : > { %v722_v42 = vsub.f32 %v713_v33, %v718_v41 }
 0x329   : > { %v724_v43 = vmul.f32 1.442695, %v722_v42 }
 0x32a   : > { %v721_v44 = vpop.xlane.xlu1 %720  ;;  %v887_v52 = vpop.permute.xlu0 %886 }
 0x32b   : > { %2023 = vpow2.f32 %v724_v43  ;;  %v723_v45 = vsub.f32 %v714_v37, %v721_v44  ;;  %v1309_v44 = vsub.s32 5, %v2307_v47 }
 0x32d   : > { %v726_v46 = vmul.f32 1.442695, %v723_v45  ;;  %v1310_v45 = vrot.slane %v2311_v49, %v1309_v44 }
 0x32e   : > { %v965_v53 = vpop.permute.xlu1 %964 }
 0x32f   : > { %2025 = vpow2.f32 %v726_v46 }
 0x332   : > { %v963_v55 = vpop.permute.xlu1 %962 }
 0x335   : > { %v2024_v50 = vpop.eup %2023 }
 0x336   : > { %1806 = vmatmul.mubr.msk.f32.vlgmr.msra.gmra.mrb[8].mxu1 %vm715_vm3, %v2024_v50  ;;  %v728_v18 = vsel %vm715_vm3, %v2024_v50, 0.0 }
 0x337   : > { %1809 = vmatpush3.msra.mxu1 %v2348_v25  ;;  %1810 = vmatprep.mubr.msk.f32.mxu1 %vm2126_vm0, %v2124_v5 }
 0x338   : > { %1813 = vmatprep.subr.mxu1 %v2124_v5 }
 0x339   : > { %v2026_v51 = vpop.eup %2025 }
 0x33a   : > { %1811 = vmatmul.mubr.msk.f32.vlgmr.msra.gmra.mrb[10].mxu1 %vm715_vm3, %v2026_v51  ;;  %v731_v20 = vsel %vm715_vm3, %v2026_v51, 0.0 }
 0x33b   : > { %1815 = vmatprep.mubr.msk.f32.mxu1 %vm2126_vm0, %v2124_v5 }
 0x33e   : > { %1814 = vmatpush3.xpose.msk.msra.mxu1 %vm558_vm1, %v887_v52 }
 0x33f   : > { %1818 = vmatprep.subr.mxu1 %v2124_v5 }
 0x341   : > { %1816 = vmatmul.mubr.msk.f32.vlgmr.msra.gmra.mrb[12].mxu1 %vm558_vm1, %v885_v40 }
 0x342   : > { %1819 = vmatpush3.xpose.msk.msra.mxu1 %vm558_vm1, %v965_v53  ;;  %1820 = vmatprep.mubr.msk.f32.mxu1 %vm2126_vm0, %v2124_v5 }
 0x343   : > { %1823 = vmatprep.subr.mxu1 %v2124_v5 }
 0x345   : > { %1821 = vmatmul.mubr.msk.f32.vlgmr.msra.gmra.mrb[14].mxu1 %vm558_vm1, %v963_v55 }
 0x346   : > { %1825 = vmatprep.mubr.msk.f32.mxu1 %vm2126_vm0, %v2124_v5 }
 0x409   : > { %v2394_v56 = vpop.f32.mrb[8].mxu1 }
 0x40a   : > { %v1807_v57 = vpop.f32.mrb[9].mxu1 }
 0x40d   : > { %v2396_v58 = vpop.f32.mrb[10].mxu1 }
 0x40e   : > { %v1812_v59 = vpop.f32.mrb[11].mxu1 }
 0x40f   : > { %v1995_v59 = vld [vmem:[%s2240_s9 + $0x10] ss:$24 sps:$4 sm:$0xff]  }
 0x414   : > { %v958_v60 = vpop.f32.mrb[12].mxu1 }
 0x415   : > { %v1040_v61 = vsel %vm557_vm2, %v958_v60, -1e+30  ;;  %v1817_v62 = vpop.f32.mrb[13].mxu1  ;;  %v1999_v60 = vld [vmem:[%s2240_s9 + $0x70] ss:$24 sps:$4 sm:$0xff]  }
 0x416   : > { %v1042_v63 = vsel %vm715_vm3, %v1040_v61, -inf  ;;  %v2003_v62 = vld [vmem:[%s2240_s9 + $0xd0] ss:$24 sps:$4 sm:$0xff]  }
 0x417   : > { %1043 = vmax.xlane.f32.xlu0 %v1042_v63  ;;  %v2005_v63 = vld [vmem:[%s2240_s9 + $0x100] ss:$24 sps:$4 sm:$0xff]  }
 0x418   : > { %v1036_v0 = vpop.f32.mrb[14].mxu1 }
 0x419   : > { %v1041_v1 = vsel %vm557_vm2, %v1036_v0, -1e+30  ;;  %v1822_v4 = vpop.f32.mrb[15].mxu1  ;;  %v2007_v0 = vld [vmem:[%s2240_s9 + $0x130] ss:$24 sps:$4 sm:$0xff]  }
 0x41a   : > { %v1045_v6 = vsel %vm715_vm3, %v1041_v1, -inf }
 0x41b   : > { %1046 = vmax.xlane.f32.xlu1 %v1045_v6 }
 0x42c   : > { %1138 = vrot.lane.b32.xlu1 %v2348_v25, %s2127_s13 }
 0x42d   : > { %1061 = vrot.lane.b32.xlu0 %v2358_v30, %s2127_s13 }
 0x4a4   : > { %v1044_v7 = vpop.xlane.xlu0 %1043 }
 0x4a5   : > { %v1048_v8 = vsub.f32 %v1040_v61, %v1044_v7  ;;  %v2001_v61 = vld [vmem:[%s2240_s9 + $0xa0] ss:$24 sps:$4 sm:$0xff]  }
 0x4a7   : > { %v1050_v9 = vmul.f32 1.442695, %v1048_v8 }
 0x4a8   : > { %v1062_v10 = vpop.permute.xlu0 %1061  ;;  %v1047_v11 = vpop.xlane.xlu1 %1046 }
 0x4a9   : > { %2027 = vpow2.f32 %v1050_v9  ;;  %v1049_v12 = vsub.f32 %v1041_v1, %v1047_v11  ;;  %1824 = vmatpush3.msra.mxu1 %v1062_v10  ;;  %v2009_v1 = vld [vmem:[%s2240_s9 + $0x160] ss:$24 sps:$4 sm:$0xff]  }
 0x4aa   : > { %1828 = vmatprep.subr.mxu1 %v2124_v5 }
 0x4ab   : > { %v1052_v13 = vmul.f32 1.442695, %v1049_v12 }
 0x4ac   : > { %v1139_v15 = vpop.permute.xlu1 %1138 }
 0x4ad   : > { %2029 = vpow2.f32 %v1052_v13 }
 0x4b3   : > { %v2028_v14 = vpop.eup %2027 }
 0x4b4   : > { %1826 = vmatmul.mubr.msk.f32.vlgmr.msra.gmra.mrb[16].mxu1 %vm715_vm3, %v2028_v14  ;;  %v1054_v16 = vsel %vm715_vm3, %v2028_v14, 0.0 }
 0x4b5   : > { %1829 = vmatpush3.msra.mxu1 %v1139_v15  ;;  %1055 = vadd.xlane.f32.xlu0 %v1054_v16 }
 0x4b6   : > { %1830 = vmatprep.mubr.msk.f32.mxu1 %vm2126_vm0, %v2124_v5  ;;  %1853 = vmatprep.subr.bf16.mxu1 %v2124_v5 }
 0x4b7   : > { %v2030_v17 = vpop.eup %2029 }
 0x4b8   : > { %1831 = vmatmul.mubr.msk.f32.vlgmr.msra.gmra.mrb[18].mxu1 %vm715_vm3, %v2030_v17  ;;  %v1057_v19 = vsel %vm715_vm3, %v2030_v17, 0.0 }
 0x4b9   : > { %729 = vadd.xlane.f32.xlu0 %v728_v18  ;;  %1058 = vadd.xlane.f32.xlu1 %v1057_v19  ;;  %v1341_v19 = vsub.s32 6, %v2307_v47 }
 0x4ba   : > { %1869 = vmatprep.mubr.msk.bf16.mxu1 %vm2126_vm0, %v2124_v5  ;;  %1854 = vmatpush3.bf16.msra.mxu1 %v1995_v59 }
 0x4bb   : > { %1855 = vmatprep.subr.bf16.mxu1 %v2124_v5 }
 0x4bd   : > { %732 = vadd.xlane.f32.xlu0 %v731_v20 }
 0x542   : > { %v1056_v21 = vpop.xlane.xlu0 %1055 }
 0x543   : > { %2031 = vrcp.f32 %v1056_v21 }
 0x546   : > { %v1059_v22 = vpop.xlane.xlu1 %1058  ;;  %v730_v32 = vpop.xlane.xlu0 %729 }
 0x547   : > { %2033 = vrcp.f32 %v1059_v22 }
 0x548   : > { %2035 = vrcp.f32 %v730_v32 }
 0x54a   : > { %v733_v33 = vpop.xlane.xlu0 %732 }
 0x54b   : > { %2037 = vrcp.f32 %v733_v33 }
 0x54d   : > { %v2032_v25 = vpop.eup %2031 }
 0x551   : > { %v2034_v26 = vpop.eup %2033 }
 0x552   : > { %v2036_v34 = vpop.eup %2035 }
 0x553   : > { %v882_v37 = vmul.f32 %v2036_v34, %v2394_v56  ;;  %v2011_v34 = vld [vmem:[%s2240_s9 + $0x14] ss:$24 sps:$4 sm:$0xff]  }
 0x555   : > { %v2038_v35 = vpop.eup %2037 }
 0x556   : > { %v883_v38 = vmul.f32 %v2038_v35, %v2396_v58  ;;  %v2012_v35 = vld [vmem:[%s2240_s9 + $0x44] ss:$24 sps:$4 sm:$0xff]  }
 0x587   : > { %v1133_v23 = vpop.f32.mrb[16].mxu1 }
 0x588   : > { %v1827_v24 = vpop.f32.mrb[17].mxu1  ;;  %v1216_v28 = vmul.f32 %v2032_v25, %v1133_v23  ;;  %v1342_v23 = vrot.slane %v2311_v49, %v1341_v19 }
 0x589   : > { %v1347_v24 = vsub.s32 7, %v2307_v47 }
 0x58b   : > { %v1210_v27 = vpop.f32.mrb[18].mxu1 }
 0x58c   : > { %v1217_v29 = vmul.f32 %v2034_v26, %v1210_v27  ;;  %v1832_v30 = vpop.f32.mrb[19].mxu1 }
 0x58e   : > { %v1942_v31 = vpack.i.bf16 %v1217_v29, %v1216_v28  ;;  %v1348_v29 = vrot.slane %v2311_v49, %v1347_v24  ;;  %v2014_v49 = vld [vmem:[%s2240_s9 + $0xa4] ss:$24 sps:$4 sm:$0xff]  }
 0x590   : > { %1943 = vrot.lane.b32.xlu0 %v1942_v31, %s2128_s14 }
 0x602   : > { %v1944_v36 = vpop.permute.xlu0 %1943 }
 0x603   : > { %v1946_v39 = vunpack.i.h.bf16 %v1944_v36  ;;  %v1945_v40 = vunpack.i.l.bf16 %v1944_v36  ;;  %v2013_v36 = vld [vmem:[%s2240_s9 + $0x74] ss:$24 sps:$4 sm:$0xff]  }
 0x605   : > { %v1227_v41 = vsel %vm558_vm1, %v883_v38, %v1946_v39  ;;  %v1226_v42 = vsel %vm558_vm1, %v882_v37, %v1945_v40  ;;  %v2015_v37 = vld [vmem:[%s2240_s9 + $0xd4] ss:$24 sps:$4 sm:$0xff]   ;;  %v2016_v38 = vld [vmem:[%s2240_s9 + $0x104] ss:$24 sps:$4 sm:$0xff]  }
 0x606   : > { %v1695_v43 = vpack.c.bf16 %v1227_v41, %v1226_v42  ;;  %v2017_v39 = vld [vmem:[%s2240_s9 + $0x134] ss:$24 sps:$4 sm:$0xff]   ;;  %v2018_v40 = vld [vmem:[%s2240_s9 + $0x164] ss:$24 sps:$4 sm:$0xff]  }
 0x607   : > { %v281_v41 = vld [vmem:[%s2251_s8 + $0x8] sm:$0xff] }
 0x608   : > { %1850 = vmatmul.mubr.msk.bf16.vlgmr.msra.gmra.mrb[4].mxu0 %vm1694_vm5, %v1695_v43  ;;  %v1355_v42 = vrot.slane %v281_v41, %v312_v48 }
 0x609   : > { %1889 = vmatprep.mubr.msk.bf16.mxu0 %vm2126_vm0, %v2124_v5  ;;  %1874 = vmatpush3.bf16.msra.mxu0 %v2011_v34 }
 0x60a   : > { %1875 = vmatprep.subr.bf16.mxu0 %v2124_v5 }
 0x60d   : > { %1876 = vmatpush3.bf16.msra.mxu0 %v2012_v35 }
 0x60e   : > { %1877 = vmatprep.subr.bf16.mxu0 %v2124_v5 }
 0x611   : > { %1878 = vmatpush3.bf16.msra.mxu0 %v2013_v36 }
 0x612   : > { %1879 = vmatprep.subr.bf16.mxu0 %v2124_v5 }
 0x615   : > { %1880 = vmatpush3.bf16.msra.mxu0 %v2014_v49 }
 0x616   : > { %1881 = vmatprep.subr.bf16.mxu0 %v2124_v5 }
 0x619   : > { %1882 = vmatpush3.bf16.msra.mxu0 %v2015_v37 }
 0x61a   : > { %1883 = vmatprep.subr.bf16.mxu0 %v2124_v5 }
 0x61d   : > { %1884 = vmatpush3.bf16.msra.mxu0 %v2016_v38 }
 0x61e   : > { %1885 = vmatprep.subr.bf16.mxu0 %v2124_v5 }
 0x621   : > { %1886 = vmatpush3.bf16.msra.mxu0 %v2017_v39 }
 0x622   : > { %1887 = vmatprep.subr.bf16.mxu0 %v2124_v5 }
 0x625   : > { %1888 = vmatpush3.bf16.msra.mxu0 %v2018_v40 }
 0x6db   : > { %v1298_v46 = vpop.f32.mrb[4].mxu0 }
 0x6dc   : > { %v1305_v50 = vadd.f32 %v1298_v46, %v2260_v2  ;;  %v1851_v51 = vpop.f32.mrb[5].mxu0 }
 0x6dd   : > { %v1301_v52 = vpop.f32.mrb[6].mxu0 }
 0x6de   : > { %v2429_v53 = vadd.f32 %v1310_v45, %v1305_v50  ;;  %v1306_v55 = vadd.f32 %v1301_v52, %v2262_v3  ;;  %v1852_v56 = vpop.f32.mrb[7].mxu0  ;;  %v1997_v3 = vld [vmem:[%s2240_s9 + $0x40] ss:$24 sps:$4 sm:$0xff]  }
 0x6df   : > { %1856 = vmatpush3.bf16.msra.mxu1 %v1997_v3 }
 0x6e0   : > { %1313 = vadd.xlane.f32.xlu1 %v2429_v53  ;;  %v2433_v57 = vadd.f32 %v1310_v45, %v1306_v55  ;;  %v1319_v2 = vmul.f32 %v2429_v53, %v2429_v53  ;;  %1857 = vmatprep.subr.bf16.mxu1 %v2124_v5 }
 0x6e2   : > { %v1320_v58 = vmul.f32 %v2433_v57, %v2433_v57 }
 0x6e3   : > { %1858 = vmatpush3.bf16.msra.mxu1 %v1999_v60 }
 0x6e4   : > { %1315 = vadd.xlane.f32.xlu1 %v2433_v57  ;;  %1859 = vmatprep.subr.bf16.mxu1 %v2124_v5 }
 0x6e7   : > { %1860 = vmatpush3.bf16.msra.mxu1 %v2001_v61 }
 0x6e8   : > { %1321 = vadd.xlane.f32.xlu1 %v1319_v2  ;;  %1861 = vmatprep.subr.bf16.mxu1 %v2124_v5 }
 0x6eb   : > { %1862 = vmatpush3.bf16.msra.mxu1 %v2003_v62 }
 0x6ec   : > { %1323 = vadd.xlane.f32.xlu1 %v1320_v58  ;;  %1863 = vmatprep.subr.bf16.mxu1 %v2124_v5 }
 0x6ef   : > { %1864 = vmatpush3.bf16.msra.mxu1 %v2005_v63 }
 0x6f0   : > { %1865 = vmatprep.subr.bf16.mxu1 %v2124_v5 }
 0x6f3   : > { %1866 = vmatpush3.bf16.msra.mxu1 %v2007_v0  ;;  %v1540_v0 = vrot.slane %v281_v41, %v318_v54 }
 0x6f4   : > { %1867 = vmatprep.subr.bf16.mxu1 %v2124_v5 }
 0x6f7   : > { %1868 = vmatpush3.bf16.msra.mxu1 %v2009_v1 }
 0x76d   : > { %v1314_v4 = vpop.xlane.xlu1 %1313 }
 0x76e   : > { %v1317_v7 = vmul.f32 0.03125, %v1314_v4 }
 0x770   : > { %v1327_v9 = vmul.f32 %v1317_v7, %v1317_v7  ;;  %v1335_v20 = vsub.f32 %v2429_v53, %v1317_v7 }
 0x771   : > { %v1316_v6 = vpop.xlane.xlu1 %1315 }
 0x772   : > { %v1318_v10 = vmul.f32 0.03125, %v1316_v6 }
 0x774   : > { %v1328_v14 = vmul.f32 %v1318_v10, %v1318_v10  ;;  %v1336_v25 = vsub.f32 %v2433_v57, %v1318_v10 }
 0x775   : > { %v1322_v8 = vpop.xlane.xlu1 %1321 }
 0x776   : > { %v1325_v11 = vmul.f32 0.03125, %v1322_v8 }
 0x778   : > { %v1329_v12 = vsub.f32 %v1325_v11, %v1327_v9 }
 0x779   : > { %v1324_v13 = vpop.xlane.xlu1 %1323 }
 0x77a   : > { %v1331_v15 = vadd.f32 1e-05, %v1329_v12  ;;  %v1326_v16 = vmul.f32 0.03125, %v1324_v13 }
 0x77c   : > { %2039 = vrsqrt.f32 %v1331_v15  ;;  %v1330_v17 = vsub.f32 %v1326_v16, %v1328_v14 }
 0x77e   : > { %v1332_v18 = vadd.f32 1e-05, %v1330_v17 }
 0x780   : > { %2041 = vrsqrt.f32 %v1332_v18 }
 0x786   : > { %v2040_v21 = vpop.eup %2039 }
 0x787   : > { %v1337_v22 = vmul.f32 %v2040_v21, %v1335_v20 }
 0x789   : > { %v1343_v28 = vmul.f32 %v1342_v23, %v1337_v22 }
 0x78a   : > { %v2042_v26 = vpop.eup %2041 }
 0x78b   : > { %v1338_v27 = vmul.f32 %v2042_v26, %v1336_v25  ;;  %v1349_v31 = vadd.f32 %v1348_v29, %v1343_v28  ;;  %v1716_v26 = vld [vmem:[%s2512_s3] ss:$0 sm:$0xff] (!%p1715_p7)  ;;  %v1717_v28 = vld [vmem:[%s2512_s3 + $0x1] ss:$0 sm:$0xff] (!%p1715_p7) }
 0x78d   : > { %v1344_v30 = vmul.f32 %v1342_v23, %v1338_v27 }
 0x78f   : > { %v1350_v32 = vadd.f32 %v1348_v29, %v1344_v30 }
 0x791   : > { %v1351_v33 = vpack.c.bf16 %v1350_v32, %v1349_v31 }
 0x793   : > { %1870 = vmatmul.mubr.bf16.vlgmr.msra.gmra.mrb[20].mxu1 %v1351_v33 }
 0x866   : > { %v1438_v43 = vpop.f32.mrb[20].mxu1 }
 0x867   : > { %v1439_v44 = vadd.f32 %v1438_v43, %v1355_v42  ;;  %v1871_v45 = vpop.f32.mrb[21].mxu1 }
 0x868   : > { %v1441_v46 = vpop.f32.mrb[22].mxu1 }
 0x869   : > { %v1705_v50 = vmul.f32 -1.702, %v1439_v44  ;;  %v1442_v51 = vadd.f32 %v1441_v46, %v1355_v42  ;;  %v1872_v52 = vpop.f32.mrb[23].mxu1 }
 0x86b   : > { %v1449_v55 = vmul.f32 1.442695, %v1705_v50  ;;  %v1706_v56 = vmul.f32 -1.702, %v1442_v51 }
 0x86d   : > { %2043 = vpow2.f32 %v1449_v55  ;;  %v1451_v2 = vmul.f32 1.442695, %v1706_v56 }
 0x86f   : > { %2045 = vpow2.f32 %v1451_v2 }
 0x877   : > { %v2044_v58 = vpop.eup %2043 }
 0x878   : > { %v1453_v5 = vadd.f32 1.0, %v2044_v58 }
 0x879   : > { %v2046_v59 = vpop.eup %2045 }
 0x87a   : > { %2047 = vrcp.f32 %v1453_v5  ;;  %v1454_v3 = vadd.f32 1.0, %v2046_v59 }
 0x87c   : > { %2049 = vrcp.f32 %v1454_v3 }
 0x884   : > { %v2048_v60 = vpop.eup %2047 }
 0x885   : > { %v1459_v61 = vmul.f32 %v2048_v60, %v1439_v44 }
 0x886   : > { %v2050_v48 = vpop.eup %2049 }
 0x887   : > { %v1460_v62 = vmul.f32 %v2050_v48, %v1442_v51 }
 0x889   : > { %v1461_v63 = vpack.c.bf16 %v1460_v62, %v1459_v61 }
 0x88b   : > { %1890 = vmatmul.mubr.bf16.vlgmr.msra.gmra.mrb[8].mxu0 %v1461_v63 }
 0x95e   : > { %v1528_v1 = vpop.f32.mrb[8].mxu0 }
 0x95f   : > { %v1535_v4 = vadd.f32 %v1528_v1, %v2429_v53  ;;  %v1891_v6 = vpop.f32.mrb[9].mxu0  ;;  %1548 = sbr.rel (%p1715_p7) target bundleno = 2575 (0xa0f), region = 48 }
 0x960   : > { %v1531_v7 = vpop.f32.mrb[10].mxu0 }
 0x961   : > { %v1541_v8 = vadd.f32 %v1540_v0, %v1535_v4  ;;  %v1536_v9 = vadd.f32 %v1531_v7, %v2433_v57  ;;  %v1892_v10 = vpop.f32.mrb[11].mxu0 }
 0x963   : > { %1543 = vst [vmem:[#allocation2] sm:$0xff] %v1541_v8  ;;  %v1542_v11 = vadd.f32 %v1540_v0, %v1536_v9  ;;  %1551 = vadd.xlane.f32.xlu0 (!%p1715_p7), %v1541_v8  ;;  %v1557_v12 = vmul.f32 (!%p1715_p7), %v1541_v8, %v1541_v8 }
 0x965   : > { %1544 = vst [vmem:[#allocation2 + $0x8] sm:$0xff] %v1542_v11  ;;  %1559 = vadd.xlane.f32.xlu1 (!%p1715_p7), %v1557_v12  ;;  %v1558_v47 = vmul.f32 (!%p1715_p7), %v1542_v11, %v1542_v11 }
 0x967   : > { %1553 = vadd.xlane.f32.xlu0 %v1542_v11 }
 0x969   : > { %1561 = vadd.xlane.f32.xlu1 %v1558_v47 }
 0x9f0   : > { %v1552_v54 = vpop.xlane.xlu0 %1551 }
 0x9f1   : > { %v1555_v53 = vmul.f32 0.03125, %v1552_v54 }
 0x9f2   : > { %v1560_v13 = vpop.xlane.xlu1 %1559 }
 0x9f3   : > { %v1565_v14 = vmul.f32 %v1555_v53, %v1555_v53  ;;  %v1563_v15 = vmul.f32 0.03125, %v1560_v13  ;;  %v1573_v24 = vsub.f32 %v1541_v8, %v1555_v53 }
 0x9f4   : > { %v1554_v16 = vpop.xlane.xlu0 %1553 }
 0x9f5   : > { %v1567_v57 = vsub.f32 %v1563_v15, %v1565_v14  ;;  %v1556_v17 = vmul.f32 0.03125, %v1554_v16 }
 0x9f6   : > { %v1562_v18 = vpop.xlane.xlu1 %1561 }
 0x9f7   : > { %v1569_v19 = vadd.f32 1e-05, %v1567_v57  ;;  %v1566_v20 = vmul.f32 %v1556_v17, %v1556_v17  ;;  %v1564_v21 = vmul.f32 0.03125, %v1562_v18  ;;  %v1574_v30 = vsub.f32 %v1542_v11, %v1556_v17 }
 0x9f9   : > { %2051 = vrsqrt.f32 %v1569_v19  ;;  %v1568_v22 = vsub.f32 %v1564_v21, %v1566_v20 }
 0x9fb   : > { %v1570_v23 = vadd.f32 1e-05, %v1568_v22 }
 0x9fd   : > { %2053 = vrsqrt.f32 %v1570_v23 }
 0xa03   : > { %v2052_v25 = vpop.eup %2051 }
 0xa04   : > { %v1575_v27 = vmul.f32 %v2052_v25, %v1573_v24 }
 0xa06   : > { %v1581_v29 = vmul.f32 %v1716_v26, %v1575_v27 }
 0xa07   : > { %v2054_v31 = vpop.eup %2053 }
 0xa08   : > { %v1587_v32 = vadd.f32 %v1717_v28, %v1581_v29  ;;  %v1576_v33 = vmul.f32 %v2054_v31, %v1574_v30 }
 0xa0a   : > { %1589 = vst [vmem:[%s2513_s4] sm:$0xff] %v1587_v32  ;;  %v1582_v34 = vmul.f32 %v1716_v26, %v1576_v33 }
 0xa0c   : > { %v1588_v35 = vadd.f32 %v1717_v28, %v1582_v34 }
 0xa0e   : > { %1590 = vst [vmem:[%s2513_s4 + $0x8] sm:$0xff] %v1588_v35 }
 0xa0f PF: > { %p14_p4 = scmp.ge.s32.totalorder %s2176_s20, 4   ;;  %s2517_s15 = smov %s2111_s16 }
 0xa10   : > { %s2518_s16 = smov %s2115_s17  ;;  %s2519_s17 = smov %s2186_s23 }
 0xa11   : > { %s2520_s18 = smov %s2176_s20  ;;  %16 = sbr.rel (!%p14_p4) target bundleno = 3 (0x3), region = 83 }
 0xa18   :  { %1602 = vsyncpa [#allocation4], 1 }
 0xa19   :  { %1604 = vsyncpa [#allocation4 + $0x1], 1 }

</bundles_post_ra>
